<compile_context>
chip_gen: v6e
topology: v6e:2x2x1
jax: 0.10.0
libtpu: 0.0.40
codegen_flags: <defaults>
</compile_context>

<pallas_src>
import math

import jax
import jax.numpy as jnp
from jax import lax
from jax.experimental import pallas as pl
from jax.experimental.pallas import tpu as pltpu

# ----- small, module-consistent shapes -----
B = 2                 # batch
S = 8                 # max sequence length
H = 32                # hidden size
N_HEADS = 2
HEAD_DIM = H // N_HEADS
INNER = 4 * H         # feed-forward inner size (= 128 lanes, exactly one vreg row)
N_ITEMS = 50          # item vocabulary (index 0 = padding)
VOCAB = N_ITEMS + 1
R = B * S             # batch folded into rows
LN_EPS = 1e-12
NEG_INF = -1e9

# Row layout of the packed parameter-vector slab ("vecs", shape (NVEC, 128)).
(ROW_BQKV, ROW_LN0G, ROW_LN0B, ROW_BO, ROW_LN1G, ROW_LN1B,
 ROW_B1, ROW_B2, ROW_LN2G, ROW_LN2B) = range(10)
NVEC = 10


def _layernorm(x, gamma, beta):
    mu = jnp.mean(x, axis=-1, keepdims=True)
    var = jnp.mean((x - mu) ** 2, axis=-1, keepdims=True)
    return (x - mu) * lax.rsqrt(var + LN_EPS) * gamma + beta


def _gelu(x):
    # tanh-approx GELU; reference nn.GELU(erf) differs at ~1e-3 relative level.
    c = math.sqrt(2.0 / math.pi)
    return 0.5 * x * (1.0 + jnp.tanh(c * (x + 0.044715 * x * x * x)))


def sasrec_fwd_kernel(onehot_ref, pos_ref, mask_ref, sel_ref, emb_ref,
                      w_attn_ref, w1_ref, w2_ref, vecs_ref, out_ref):
    f32 = jnp.float32
    bf16 = jnp.bfloat16
    V = vecs_ref[...]                                      # (NVEC, 128) f32

    # ---- embedding lookup (one-hot matmul == gather) + position embedding ----
    x = jnp.dot(onehot_ref[...], emb_ref[...], preferred_element_type=f32)   # (R, H)
    x = x + pos_ref[...]
    x = _layernorm(x, V[ROW_LN0G:ROW_LN0G + 1, :H], V[ROW_LN0B:ROW_LN0B + 1, :H])

    # ---- fused QKV(+O) projection: one (R,H)@(H,4H) matmul ----
    Wa = w_attn_ref[...]                                   # (H, 4H) bf16 = [wq*s|wk|wv|wo]
    qkvo = jnp.dot(x.astype(bf16), Wa, preferred_element_type=f32)           # (R, 4H)
    qkvo = qkvo + V[ROW_BQKV:ROW_BQKV + 1, :]              # bias row (lanes 3H: are zero)
    q = qkvo[:, 0:H]                                       # scale already folded into wq/bq
    k = qkvo[:, H:2 * H]
    v = qkvo[:, 2 * H:3 * H]
    Wo = Wa[:, 3 * H:]                                     # (H, H) bf16 output projection

    mask = mask_ref[...]                                   # (R, R) additive: 0 / -1e9
    attn = jnp.zeros((R, H), f32)
    for h in range(N_HEADS):                               # static unroll; accumulate, no concat
        lo, hi = h * HEAD_DIM, (h + 1) * HEAD_DIM
        qh = q[:, lo:hi].astype(bf16)
        kh = k[:, lo:hi].astype(bf16)
        vh = v[:, lo:hi].astype(bf16)
        # scores = q @ k^T, expressed as dot_general contracting the last dims
        s = lax.dot_general(qh, kh, (((1,), (1,)), ((), ())),
                            preferred_element_type=f32) + mask               # (R, R)
        s = s - jnp.max(s, axis=-1, keepdims=True)
        e = jnp.exp(s)
        p = e * pl.reciprocal(jnp.sum(e, axis=-1, keepdims=True), approx=True)
        ctx = jnp.dot(p.astype(bf16), vh, preferred_element_type=f32)        # (R, D)
        # fold this head's context straight through its row-block of wo
        attn = attn + jnp.dot(ctx.astype(bf16), Wo[lo:hi, :],
                              preferred_element_type=f32)                    # (R, H)
    attn = attn + V[ROW_BO:ROW_BO + 1, :H]

    x1 = _layernorm(x + attn, V[ROW_LN1G:ROW_LN1G + 1, :H], V[ROW_LN1B:ROW_LN1B + 1, :H])

    # ---- feed-forward ----
    h1 = jnp.dot(x1.astype(bf16), w1_ref[...], preferred_element_type=f32)
    h1 = _gelu(h1 + V[ROW_B1:ROW_B1 + 1, :])                                 # (R, INNER)
    h2 = jnp.dot(h1.astype(bf16), w2_ref[...], preferred_element_type=f32)
    h2 = h2 + V[ROW_B2:ROW_B2 + 1, :H]
    x2 = _layernorm(x1 + h2, V[ROW_LN2G:ROW_LN2G + 1, :H], V[ROW_LN2B:ROW_LN2B + 1, :H])

    # ---- gather_indexes fused: one-hot row selection via matmul ----
    out_ref[...] = jnp.dot(sel_ref[...], x2, preferred_element_type=f32)     # (B, H)


def init_params(key):
    """Deterministic synthetic parameter init (N(0, 0.02) like SASRec)."""
    names_shapes = [
        ("item_emb", (VOCAB, H)),
        ("pos_emb", (S, H)),
        ("ln0_g", (1, H)), ("ln0_b", (1, H)),
        ("wq", (H, H)), ("bq", (1, H)),
        ("wk", (H, H)), ("bk", (1, H)),
        ("wv", (H, H)), ("bv", (1, H)),
        ("wo", (H, H)), ("bo", (1, H)),
        ("ln1_g", (1, H)), ("ln1_b", (1, H)),
        ("w1", (H, INNER)), ("b1", (1, INNER)),
        ("w2", (INNER, H)), ("b2", (1, H)),
        ("ln2_g", (1, H)), ("ln2_b", (1, H)),
    ]
    keys = jax.random.split(key, len(names_shapes))
    params = {}
    for (name, shape), k in zip(names_shapes, keys):
        if name.endswith("_g"):
            params[name] = jnp.ones(shape, jnp.float32)
        elif name.endswith("_b") or name.startswith("b"):
            params[name] = jnp.zeros(shape, jnp.float32)
        else:
            params[name] = 0.02 * jax.random.normal(k, shape, jnp.float32)
    params["item_emb"] = params["item_emb"].at[0].set(0.0)  # zero padding-item row
    return params


def pack_params(params):
    """Pack the 20 raw tensors into 6 kernel inputs (bf16 matmul weights, f32 vecs)."""
    f32 = jnp.float32
    scale = 1.0 / math.sqrt(HEAD_DIM)
    # fold the attention scale into wq / bq offline
    w_attn = jnp.concatenate(
        [params["wq"] * scale, params["wk"], params["wv"], params["wo"]],
        axis=1).astype(jnp.bfloat16)                       # (H, 4H)

    vecs = jnp.zeros((NVEC, INNER), f32)
    vecs = vecs.at[ROW_BQKV, 0:3 * H].set(
        jnp.concatenate([params["bq"][0] * scale, params["bk"][0], params["bv"][0]]))
    vecs = vecs.at[ROW_LN0G, :H].set(params["ln0_g"][0])
    vecs = vecs.at[ROW_LN0B, :H].set(params["ln0_b"][0])
    vecs = vecs.at[ROW_BO, :H].set(params["bo"][0])
    vecs = vecs.at[ROW_LN1G, :H].set(params["ln1_g"][0])
    vecs = vecs.at[ROW_LN1B, :H].set(params["ln1_b"][0])
    vecs = vecs.at[ROW_B1, :INNER].set(params["b1"][0])
    vecs = vecs.at[ROW_B2, :H].set(params["b2"][0])
    vecs = vecs.at[ROW_LN2G, :H].set(params["ln2_g"][0])
    vecs = vecs.at[ROW_LN2B, :H].set(params["ln2_b"][0])

    return {
        "item_emb": params["item_emb"].astype(f32),                       # (VOCAB, H)
        "pos_rows": jnp.tile(params["pos_emb"], (B, 1)).astype(f32),      # (R, H)
        "w_attn": w_attn,                                                 # (H, 4H) bf16
        "w1": params["w1"].astype(jnp.bfloat16),                          # (H, INNER)
        "w2": params["w2"].astype(jnp.bfloat16),                          # (INNER, H)
        "vecs": vecs,                                                     # (NVEC, 128)
    }


@jax.jit
def learner_model_forward(item_seq, item_seq_len, packed):
    """Equivalent of LearnerModel.forward -> wrapped SASRec-style model forward.

    Returns the sequence representation at the last valid position: (B, H).
    """
    flat = item_seq.reshape(R)
    onehot = jax.nn.one_hot(flat, VOCAB, dtype=jnp.float32)               # (R, VOCAB)

    # combined attention mask: same-batch block-diagonal AND causal AND key-valid
    rows = jnp.arange(R)
    same_batch = (rows[:, None] // S) == (rows[None, :] // S)
    causal = (rows[:, None] % S) >= (rows[None, :] % S)
    key_valid = (flat > 0)[None, :]                                       # pad item id == 0
    allowed = same_batch & causal & key_valid
    mask_bias = jnp.where(allowed, 0.0, NEG_INF).astype(jnp.float32)      # (R, R)

    # one-hot selector implementing gather_indexes (last valid timestep per sequence)
    last = jnp.clip(item_seq_len - 1, 0, S - 1)
    sel = jax.nn.one_hot(jnp.arange(B) * S + last, R, dtype=jnp.float32)  # (B, R)

    vmem = pl.BlockSpec(memory_space=pltpu.MemorySpace.VMEM)
    seq_output = pl.pallas_call(
        sasrec_fwd_kernel,
        out_shape=jax.ShapeDtypeStruct((B, H), jnp.float32),
        in_specs=[vmem] * 9,
        out_specs=vmem,
    )(onehot, packed["pos_rows"], mask_bias, sel, packed["item_emb"],
      packed["w_attn"], packed["w1"], packed["w2"], packed["vecs"])
    return seq_output                                                     # (B, H)


if __name__ == "__main__":
    key = jax.random.PRNGKey(0)
    k_params, k_seq = jax.random.split(key)

    params = init_params(k_params)
    packed = pack_params(params)

    item_seq = jax.random.randint(k_seq, (B, S), 1, VOCAB, dtype=jnp.int32)
    item_seq_len = jnp.array([S, S - 2], dtype=jnp.int32)
    # right-pad with item id 0 beyond each sequence length (exercises the padding mask)
    item_seq = item_seq * (jnp.arange(S)[None, :] < item_seq_len[:, None]).astype(jnp.int32)

    out = learner_model_forward(item_seq, item_seq_len, packed)
    out = jax.block_until_ready(out)

    assert out.shape == (B, H)
    assert bool(jnp.all(jnp.isfinite(out)))
    print("KERNEL_OK")
</pallas_src>

<mosaic_0001>
module attributes {stable_mosaic.version = 11 : i64} {
  func.func @sasrec_fwd_kernel(%arg0: memref<16x51xf32, #tpu.memory_space<vmem>>, %arg1: memref<16x32xf32, #tpu.memory_space<vmem>>, %arg2: memref<16x16xf32, #tpu.memory_space<vmem>>, %arg3: memref<2x16xf32, #tpu.memory_space<vmem>>, %arg4: memref<51x32xf32, #tpu.memory_space<vmem>>, %arg5: memref<32x128xbf16, #tpu.memory_space<vmem>>, %arg6: memref<32x128xbf16, #tpu.memory_space<vmem>>, %arg7: memref<128x32xbf16, #tpu.memory_space<vmem>>, %arg8: memref<10x128xf32, #tpu.memory_space<vmem>>, %arg9: memref<2x32xf32, #tpu.memory_space<vmem>>) attributes {dimension_semantics = [], scalar_prefetch = 0 : i64, scratch_operands = 0 : i64, tpu.core_type = #tpu.core_type<tc>} {
    %c0 = arith.constant 0 : index
    %c0_0 = arith.constant 0 : index
    %0 = vector.load %arg8[%c0, %c0_0] : memref<10x128xf32, #tpu.memory_space<vmem>>, vector<10x128xf32>
    %c0_1 = arith.constant 0 : index
    %c0_2 = arith.constant 0 : index
    %1 = vector.load %arg0[%c0_1, %c0_2] : memref<16x51xf32, #tpu.memory_space<vmem>>, vector<16x51xf32>
    %c0_3 = arith.constant 0 : index
    %c0_4 = arith.constant 0 : index
    %2 = vector.load %arg4[%c0_3, %c0_4] : memref<51x32xf32, #tpu.memory_space<vmem>>, vector<51x32xf32>
    %cst = arith.constant dense<0.000000e+00> : vector<16x32xf32>
    %3 = tpu.matmul %1, %2, %cst {dimension_numbers = #tpu.dot_dimension_numbers<[1], [0], [0], [1], [0, 0, 1, 1], [], []>} : vector<16x51xf32>, vector<51x32xf32>, vector<16x32xf32> -> vector<16x32xf32>
    %c0_5 = arith.constant 0 : index
    %c0_6 = arith.constant 0 : index
    %4 = vector.load %arg1[%c0_5, %c0_6] : memref<16x32xf32, #tpu.memory_space<vmem>>, vector<16x32xf32>
    %5 = arith.addf %3, %4 : vector<16x32xf32>
    %6 = vector.extract_strided_slice %0 {offsets = [1, 0], sizes = [1, 32], strides = [1, 1]} : vector<10x128xf32> to vector<1x32xf32>
    %7 = vector.extract_strided_slice %0 {offsets = [2, 0], sizes = [1, 32], strides = [1, 1]} : vector<10x128xf32> to vector<1x32xf32>
    %cst_7 = arith.constant dense<0.000000e+00> : vector<16xf32>
    %8 = vector.multi_reduction <add>, %5, %cst_7 [1] : vector<16x32xf32> to vector<16xf32>
    %9 = vector.shape_cast %8 : vector<16xf32> to vector<16x1xf32>
    %cst_8 = arith.constant 3.200000e+01 : f32
    %10 = vector.broadcast %cst_8 : f32 to vector<16x1xf32>
    %11 = arith.divf %9, %10 : vector<16x1xf32>
    %12 = vector.broadcast %11 : vector<16x1xf32> to vector<16x32xf32>
    %13 = arith.subf %5, %12 : vector<16x32xf32>
    %14 = arith.mulf %13, %13 : vector<16x32xf32>
    %cst_9 = arith.constant dense<0.000000e+00> : vector<16xf32>
    %15 = vector.multi_reduction <add>, %14, %cst_9 [1] : vector<16x32xf32> to vector<16xf32>
    %16 = vector.shape_cast %15 : vector<16xf32> to vector<16x1xf32>
    %cst_10 = arith.constant 3.200000e+01 : f32
    %17 = vector.broadcast %cst_10 : f32 to vector<16x1xf32>
    %18 = arith.divf %16, %17 : vector<16x1xf32>
    %19 = vector.broadcast %11 : vector<16x1xf32> to vector<16x32xf32>
    %20 = arith.subf %5, %19 : vector<16x32xf32>
    %cst_11 = arith.constant 9.99999996E-13 : f32
    %21 = vector.broadcast %cst_11 : f32 to vector<16x1xf32>
    %22 = arith.addf %18, %21 : vector<16x1xf32>
    %23 = math.rsqrt %22 : vector<16x1xf32>
    %24 = vector.broadcast %23 : vector<16x1xf32> to vector<16x32xf32>
    %25 = arith.mulf %20, %24 : vector<16x32xf32>
    %26 = vector.broadcast %6 : vector<1x32xf32> to vector<16x32xf32>
    %27 = arith.mulf %25, %26 : vector<16x32xf32>
    %28 = vector.broadcast %7 : vector<1x32xf32> to vector<16x32xf32>
    %29 = arith.addf %27, %28 : vector<16x32xf32>
    %c0_12 = arith.constant 0 : index
    %c0_13 = arith.constant 0 : index
    %30 = vector.load %arg5[%c0_12, %c0_13] : memref<32x128xbf16, #tpu.memory_space<vmem>>, vector<32x128xbf16>
    %31 = arith.truncf %29 : vector<16x32xf32> to vector<16x32xbf16>
    %cst_14 = arith.constant dense<0.000000e+00> : vector<16x128xf32>
    %32 = tpu.matmul %31, %30, %cst_14 {dimension_numbers = #tpu.dot_dimension_numbers<[1], [0], [0], [1], [0, 0, 1, 1], [], []>} : vector<16x32xbf16>, vector<32x128xbf16>, vector<16x128xf32> -> vector<16x128xf32>
    %33 = vector.extract_strided_slice %0 {offsets = [0, 0], sizes = [1, 128], strides = [1, 1]} : vector<10x128xf32> to vector<1x128xf32>
    %34 = vector.broadcast %33 : vector<1x128xf32> to vector<16x128xf32>
    %35 = arith.addf %32, %34 : vector<16x128xf32>
    %36 = vector.extract_strided_slice %35 {offsets = [0, 0], sizes = [16, 32], strides = [1, 1]} : vector<16x128xf32> to vector<16x32xf32>
    %37 = vector.extract_strided_slice %35 {offsets = [0, 32], sizes = [16, 32], strides = [1, 1]} : vector<16x128xf32> to vector<16x32xf32>
    %38 = vector.extract_strided_slice %35 {offsets = [0, 64], sizes = [16, 32], strides = [1, 1]} : vector<16x128xf32> to vector<16x32xf32>
    %39 = vector.extract_strided_slice %30 {offsets = [0, 96], sizes = [32, 32], strides = [1, 1]} : vector<32x128xbf16> to vector<32x32xbf16>
    %c0_15 = arith.constant 0 : index
    %c0_16 = arith.constant 0 : index
    %40 = vector.load %arg2[%c0_15, %c0_16] : memref<16x16xf32, #tpu.memory_space<vmem>>, vector<16x16xf32>
    %cst_17 = arith.constant 0.000000e+00 : f32
    %41 = vector.broadcast %cst_17 : f32 to vector<16x32xf32>
    %42 = vector.extract_strided_slice %36 {offsets = [0, 0], sizes = [16, 16], strides = [1, 1]} : vector<16x32xf32> to vector<16x16xf32>
    %43 = arith.truncf %42 : vector<16x16xf32> to vector<16x16xbf16>
    %44 = vector.extract_strided_slice %37 {offsets = [0, 0], sizes = [16, 16], strides = [1, 1]} : vector<16x32xf32> to vector<16x16xf32>
    %45 = arith.truncf %44 : vector<16x16xf32> to vector<16x16xbf16>
    %46 = vector.extract_strided_slice %38 {offsets = [0, 0], sizes = [16, 16], strides = [1, 1]} : vector<16x32xf32> to vector<16x16xf32>
    %47 = arith.truncf %46 : vector<16x16xf32> to vector<16x16xbf16>
    %cst_18 = arith.constant dense<0.000000e+00> : vector<16x16xf32>
    %48 = tpu.matmul %43, %45, %cst_18 {dimension_numbers = #tpu.dot_dimension_numbers<[1], [1], [0], [0], [0, 0, 1, 0], [], []>} : vector<16x16xbf16>, vector<16x16xbf16>, vector<16x16xf32> -> vector<16x16xf32>
    %49 = arith.addf %48, %40 : vector<16x16xf32>
    %cst_19 = arith.constant dense<0xFF800000> : vector<16xf32>
    %50 = vector.multi_reduction <maximumf>, %49, %cst_19 [1] : vector<16x16xf32> to vector<16xf32>
    %51 = vector.shape_cast %50 : vector<16xf32> to vector<16x1xf32>
    %52 = vector.broadcast %51 : vector<16x1xf32> to vector<16x16xf32>
    %53 = arith.subf %49, %52 : vector<16x16xf32>
    %54 = math.exp %53 : vector<16x16xf32>
    %cst_20 = arith.constant dense<0.000000e+00> : vector<16xf32>
    %55 = vector.multi_reduction <add>, %54, %cst_20 [1] : vector<16x16xf32> to vector<16xf32>
    %56 = vector.shape_cast %55 : vector<16xf32> to vector<16x1xf32>
    %57 = tpu.reciprocal %56 {approx = true} : vector<16x1xf32> -> vector<16x1xf32>
    %58 = vector.broadcast %57 : vector<16x1xf32> to vector<16x16xf32>
    %59 = arith.mulf %54, %58 : vector<16x16xf32>
    %60 = arith.truncf %59 : vector<16x16xf32> to vector<16x16xbf16>
    %cst_21 = arith.constant dense<0.000000e+00> : vector<16x16xf32>
    %61 = tpu.matmul %60, %47, %cst_21 {dimension_numbers = #tpu.dot_dimension_numbers<[1], [0], [0], [1], [0, 0, 1, 1], [], []>} : vector<16x16xbf16>, vector<16x16xbf16>, vector<16x16xf32> -> vector<16x16xf32>
    %62 = arith.truncf %61 : vector<16x16xf32> to vector<16x16xbf16>
    %63 = vector.extract_strided_slice %39 {offsets = [0, 0], sizes = [16, 32], strides = [1, 1]} : vector<32x32xbf16> to vector<16x32xbf16>
    %cst_22 = arith.constant dense<0.000000e+00> : vector<16x32xf32>
    %64 = tpu.matmul %62, %63, %cst_22 {dimension_numbers = #tpu.dot_dimension_numbers<[1], [0], [0], [1], [0, 0, 1, 1], [], []>} : vector<16x16xbf16>, vector<16x32xbf16>, vector<16x32xf32> -> vector<16x32xf32>
    %65 = arith.addf %41, %64 : vector<16x32xf32>
    %66 = vector.extract_strided_slice %36 {offsets = [0, 16], sizes = [16, 16], strides = [1, 1]} : vector<16x32xf32> to vector<16x16xf32>
    %67 = arith.truncf %66 : vector<16x16xf32> to vector<16x16xbf16>
    %68 = vector.extract_strided_slice %37 {offsets = [0, 16], sizes = [16, 16], strides = [1, 1]} : vector<16x32xf32> to vector<16x16xf32>
    %69 = arith.truncf %68 : vector<16x16xf32> to vector<16x16xbf16>
    %70 = vector.extract_strided_slice %38 {offsets = [0, 16], sizes = [16, 16], strides = [1, 1]} : vector<16x32xf32> to vector<16x16xf32>
    %71 = arith.truncf %70 : vector<16x16xf32> to vector<16x16xbf16>
    %cst_23 = arith.constant dense<0.000000e+00> : vector<16x16xf32>
    %72 = tpu.matmul %67, %69, %cst_23 {dimension_numbers = #tpu.dot_dimension_numbers<[1], [1], [0], [0], [0, 0, 1, 0], [], []>} : vector<16x16xbf16>, vector<16x16xbf16>, vector<16x16xf32> -> vector<16x16xf32>
    %73 = arith.addf %72, %40 : vector<16x16xf32>
    %cst_24 = arith.constant dense<0xFF800000> : vector<16xf32>
    %74 = vector.multi_reduction <maximumf>, %73, %cst_24 [1] : vector<16x16xf32> to vector<16xf32>
    %75 = vector.shape_cast %74 : vector<16xf32> to vector<16x1xf32>
    %76 = vector.broadcast %75 : vector<16x1xf32> to vector<16x16xf32>
    %77 = arith.subf %73, %76 : vector<16x16xf32>
    %78 = math.exp %77 : vector<16x16xf32>
    %cst_25 = arith.constant dense<0.000000e+00> : vector<16xf32>
    %79 = vector.multi_reduction <add>, %78, %cst_25 [1] : vector<16x16xf32> to vector<16xf32>
    %80 = vector.shape_cast %79 : vector<16xf32> to vector<16x1xf32>
    %81 = tpu.reciprocal %80 {approx = true} : vector<16x1xf32> -> vector<16x1xf32>
    %82 = vector.broadcast %81 : vector<16x1xf32> to vector<16x16xf32>
    %83 = arith.mulf %78, %82 : vector<16x16xf32>
    %84 = arith.truncf %83 : vector<16x16xf32> to vector<16x16xbf16>
    %cst_26 = arith.constant dense<0.000000e+00> : vector<16x16xf32>
    %85 = tpu.matmul %84, %71, %cst_26 {dimension_numbers = #tpu.dot_dimension_numbers<[1], [0], [0], [1], [0, 0, 1, 1], [], []>} : vector<16x16xbf16>, vector<16x16xbf16>, vector<16x16xf32> -> vector<16x16xf32>
    %86 = arith.truncf %85 : vector<16x16xf32> to vector<16x16xbf16>
    %87 = vector.extract_strided_slice %39 {offsets = [16, 0], sizes = [16, 32], strides = [1, 1]} : vector<32x32xbf16> to vector<16x32xbf16>
    %cst_27 = arith.constant dense<0.000000e+00> : vector<16x32xf32>
    %88 = tpu.matmul %86, %87, %cst_27 {dimension_numbers = #tpu.dot_dimension_numbers<[1], [0], [0], [1], [0, 0, 1, 1], [], []>} : vector<16x16xbf16>, vector<16x32xbf16>, vector<16x32xf32> -> vector<16x32xf32>
    %89 = arith.addf %65, %88 : vector<16x32xf32>
    %90 = vector.extract_strided_slice %0 {offsets = [3, 0], sizes = [1, 32], strides = [1, 1]} : vector<10x128xf32> to vector<1x32xf32>
    %91 = vector.broadcast %90 : vector<1x32xf32> to vector<16x32xf32>
    %92 = arith.addf %89, %91 : vector<16x32xf32>
    %93 = arith.addf %29, %92 : vector<16x32xf32>
    %94 = vector.extract_strided_slice %0 {offsets = [4, 0], sizes = [1, 32], strides = [1, 1]} : vector<10x128xf32> to vector<1x32xf32>
    %95 = vector.extract_strided_slice %0 {offsets = [5, 0], sizes = [1, 32], strides = [1, 1]} : vector<10x128xf32> to vector<1x32xf32>
    %cst_28 = arith.constant dense<0.000000e+00> : vector<16xf32>
    %96 = vector.multi_reduction <add>, %93, %cst_28 [1] : vector<16x32xf32> to vector<16xf32>
    %97 = vector.shape_cast %96 : vector<16xf32> to vector<16x1xf32>
    %cst_29 = arith.constant 3.200000e+01 : f32
    %98 = vector.broadcast %cst_29 : f32 to vector<16x1xf32>
    %99 = arith.divf %97, %98 : vector<16x1xf32>
    %100 = vector.broadcast %99 : vector<16x1xf32> to vector<16x32xf32>
    %101 = arith.subf %93, %100 : vector<16x32xf32>
    %102 = arith.mulf %101, %101 : vector<16x32xf32>
    %cst_30 = arith.constant dense<0.000000e+00> : vector<16xf32>
    %103 = vector.multi_reduction <add>, %102, %cst_30 [1] : vector<16x32xf32> to vector<16xf32>
    %104 = vector.shape_cast %103 : vector<16xf32> to vector<16x1xf32>
    %cst_31 = arith.constant 3.200000e+01 : f32
    %105 = vector.broadcast %cst_31 : f32 to vector<16x1xf32>
    %106 = arith.divf %104, %105 : vector<16x1xf32>
    %107 = vector.broadcast %99 : vector<16x1xf32> to vector<16x32xf32>
    %108 = arith.subf %93, %107 : vector<16x32xf32>
    %cst_32 = arith.constant 9.99999996E-13 : f32
    %109 = vector.broadcast %cst_32 : f32 to vector<16x1xf32>
    %110 = arith.addf %106, %109 : vector<16x1xf32>
    %111 = math.rsqrt %110 : vector<16x1xf32>
    %112 = vector.broadcast %111 : vector<16x1xf32> to vector<16x32xf32>
    %113 = arith.mulf %108, %112 : vector<16x32xf32>
    %114 = vector.broadcast %94 : vector<1x32xf32> to vector<16x32xf32>
    %115 = arith.mulf %113, %114 : vector<16x32xf32>
    %116 = vector.broadcast %95 : vector<1x32xf32> to vector<16x32xf32>
    %117 = arith.addf %115, %116 : vector<16x32xf32>
    %118 = arith.truncf %117 : vector<16x32xf32> to vector<16x32xbf16>
    %c0_33 = arith.constant 0 : index
    %c0_34 = arith.constant 0 : index
    %119 = vector.load %arg6[%c0_33, %c0_34] : memref<32x128xbf16, #tpu.memory_space<vmem>>, vector<32x128xbf16>
    %cst_35 = arith.constant dense<0.000000e+00> : vector<16x128xf32>
    %120 = tpu.matmul %118, %119, %cst_35 {dimension_numbers = #tpu.dot_dimension_numbers<[1], [0], [0], [1], [0, 0, 1, 1], [], []>} : vector<16x32xbf16>, vector<32x128xbf16>, vector<16x128xf32> -> vector<16x128xf32>
    %121 = vector.extract_strided_slice %0 {offsets = [6, 0], sizes = [1, 128], strides = [1, 1]} : vector<10x128xf32> to vector<1x128xf32>
    %122 = vector.broadcast %121 : vector<1x128xf32> to vector<16x128xf32>
    %123 = arith.addf %120, %122 : vector<16x128xf32>
    %cst_36 = arith.constant 5.000000e-01 : f32
    %124 = vector.broadcast %cst_36 : f32 to vector<16x128xf32>
    %125 = arith.mulf %124, %123 : vector<16x128xf32>
    %cst_37 = arith.constant 4.471500e-02 : f32
    %126 = vector.broadcast %cst_37 : f32 to vector<16x128xf32>
    %127 = arith.mulf %126, %123 : vector<16x128xf32>
    %128 = arith.mulf %127, %123 : vector<16x128xf32>
    %129 = arith.mulf %128, %123 : vector<16x128xf32>
    %130 = arith.addf %123, %129 : vector<16x128xf32>
    %cst_38 = arith.constant 0.797884583 : f32
    %131 = vector.broadcast %cst_38 : f32 to vector<16x128xf32>
    %132 = arith.mulf %131, %130 : vector<16x128xf32>
    %133 = math.tanh %132 : vector<16x128xf32>
    %cst_39 = arith.constant 1.000000e+00 : f32
    %134 = vector.broadcast %cst_39 : f32 to vector<16x128xf32>
    %135 = arith.addf %134, %133 : vector<16x128xf32>
    %136 = arith.mulf %125, %135 : vector<16x128xf32>
    %137 = arith.truncf %136 : vector<16x128xf32> to vector<16x128xbf16>
    %c0_40 = arith.constant 0 : index
    %c0_41 = arith.constant 0 : index
    %138 = vector.load %arg7[%c0_40, %c0_41] : memref<128x32xbf16, #tpu.memory_space<vmem>>, vector<128x32xbf16>
    %cst_42 = arith.constant dense<0.000000e+00> : vector<16x32xf32>
    %139 = tpu.matmul %137, %138, %cst_42 {dimension_numbers = #tpu.dot_dimension_numbers<[1], [0], [0], [1], [0, 0, 1, 1], [], []>} : vector<16x128xbf16>, vector<128x32xbf16>, vector<16x32xf32> -> vector<16x32xf32>
    %140 = vector.extract_strided_slice %0 {offsets = [7, 0], sizes = [1, 32], strides = [1, 1]} : vector<10x128xf32> to vector<1x32xf32>
    %141 = vector.broadcast %140 : vector<1x32xf32> to vector<16x32xf32>
    %142 = arith.addf %139, %141 : vector<16x32xf32>
    %143 = arith.addf %117, %142 : vector<16x32xf32>
    %144 = vector.extract_strided_slice %0 {offsets = [8, 0], sizes = [1, 32], strides = [1, 1]} : vector<10x128xf32> to vector<1x32xf32>
    %145 = vector.extract_strided_slice %0 {offsets = [9, 0], sizes = [1, 32], strides = [1, 1]} : vector<10x128xf32> to vector<1x32xf32>
    %cst_43 = arith.constant dense<0.000000e+00> : vector<16xf32>
    %146 = vector.multi_reduction <add>, %143, %cst_43 [1] : vector<16x32xf32> to vector<16xf32>
    %147 = vector.shape_cast %146 : vector<16xf32> to vector<16x1xf32>
    %cst_44 = arith.constant 3.200000e+01 : f32
    %148 = vector.broadcast %cst_44 : f32 to vector<16x1xf32>
    %149 = arith.divf %147, %148 : vector<16x1xf32>
    %150 = vector.broadcast %149 : vector<16x1xf32> to vector<16x32xf32>
    %151 = arith.subf %143, %150 : vector<16x32xf32>
    %152 = arith.mulf %151, %151 : vector<16x32xf32>
    %cst_45 = arith.constant dense<0.000000e+00> : vector<16xf32>
    %153 = vector.multi_reduction <add>, %152, %cst_45 [1] : vector<16x32xf32> to vector<16xf32>
    %154 = vector.shape_cast %153 : vector<16xf32> to vector<16x1xf32>
    %cst_46 = arith.constant 3.200000e+01 : f32
    %155 = vector.broadcast %cst_46 : f32 to vector<16x1xf32>
    %156 = arith.divf %154, %155 : vector<16x1xf32>
    %157 = vector.broadcast %149 : vector<16x1xf32> to vector<16x32xf32>
    %158 = arith.subf %143, %157 : vector<16x32xf32>
    %cst_47 = arith.constant 9.99999996E-13 : f32
    %159 = vector.broadcast %cst_47 : f32 to vector<16x1xf32>
    %160 = arith.addf %156, %159 : vector<16x1xf32>
    %161 = math.rsqrt %160 : vector<16x1xf32>
    %162 = vector.broadcast %161 : vector<16x1xf32> to vector<16x32xf32>
    %163 = arith.mulf %158, %162 : vector<16x32xf32>
    %164 = vector.broadcast %144 : vector<1x32xf32> to vector<16x32xf32>
    %165 = arith.mulf %163, %164 : vector<16x32xf32>
    %166 = vector.broadcast %145 : vector<1x32xf32> to vector<16x32xf32>
    %167 = arith.addf %165, %166 : vector<16x32xf32>
    %c0_48 = arith.constant 0 : index
    %c0_49 = arith.constant 0 : index
    %168 = vector.load %arg3[%c0_48, %c0_49] : memref<2x16xf32, #tpu.memory_space<vmem>>, vector<2x16xf32>
    %cst_50 = arith.constant dense<0.000000e+00> : vector<2x32xf32>
    %169 = tpu.matmul %168, %167, %cst_50 {dimension_numbers = #tpu.dot_dimension_numbers<[1], [0], [0], [1], [0, 0, 1, 1], [], []>} : vector<2x16xf32>, vector<16x32xf32>, vector<2x32xf32> -> vector<2x32xf32>
    %c0_51 = arith.constant 0 : index
    %c0_52 = arith.constant 0 : index
    %170 = vector.load %arg9[%c0_51, %c0_52] : memref<2x32xf32, #tpu.memory_space<vmem>>, vector<2x32xf32>
    tpu.vector_store %arg9[%c0_51, %c0_52], %169 {strides = array<i32>} : memref<2x32xf32, #tpu.memory_space<vmem>>, vector<2x32xf32>,
    return
  }
}

</mosaic_0001>

<bundles_post_ra>
// kernel: eq.1
= control target key start
LH: loop header
LB: loop body
LE: loop exit
PB: predicated region body
PF: predicated region fallthrough
CT: control target
= control target key end

     0   :  { %2 = vsyncpa [#allocation1], 0  ;;  %s59_s6 = smov [#allocation0]   ;;  %s77_s0 = inlined_call_operand.hbm [shape: s32[2,8], index: 0, kind: input, shape index: {}]   ;;  %s78_s1 = inlined_call_operand.vmem [shape: s32[16], index: 1, kind: output, shape index: {}]  }
   0x1   :  { %s7_s7 = sshll.u32 %s59_s6, 4  ;;  %s8_s7 = int_to_ptr.vmem [resolvable:$true] %s7_s7 }
   0x2   :  { %s45_s8 = scalar_lea.vmem %s8_s7, 32  ;;  %p50_p1 = scmp.lt.s32.totalorder %s8_s7, %s8_s7 }
   0x3   :  { %p46_p0 = scmp.ne.s32.totalorder %s8_s7, %s45_s8  ;;  %p51_p2 = scmp.lt.s32.totalorder %s45_s8, %s45_s8 }
   0x5   :  { %p52_p3 = por %p51_p2, %p50_p1 }
   0x7   :  { %p53_p4 = pnand %p52_p3, %p46_p0 }
   0x9   :  { %56 = shalt.err (!%p53_p4)
}
   0xa   :  { %10 = dma.hbm_to_vmem [thread:$0]  %s77_s0, 32, %s8_s7, [#allocation1]  }
   0xb   :  { %57 = dma.done.wait [#allocation1], 32  }
   0xc   :  { %58 = vsyncadd [#allocation1], 4294967264  ;;  %v15_v0 = vld [vmem:[#allocation0] sm:$0x3]  ;;  %vm18_vm0 = vcmask 64512   ;;  %s60_s0 = smov 8  }
   0xd   :  { %16 = vst [vmem:[#allocation3] sm:$0x3] %v15_v0  ;;  %vm24_vm1 = vcmask 130112  }
  0x14   :  { %v17_v1 = vld [vmem:[#allocation3] sm:$0x1]   ;;  %v21_v2 = vld [vmem:[#allocation3 + $0x1] sm:$0x1]  }
  0x15   :  { %22 = vrot.lane.b32.xlu0 %v21_v2, %s60_s0  ;;  %19 = vst.msk [vmem:[#allocation2] sm:$0x1] %vm18_vm0, %v17_v1  }
  0x87   :  { %v23_v3 = vpop.permute.xlu0 %22  }
  0x88   :  { %25 = vst.msk [vmem:[#allocation2] sm:$0x1] %vm24_vm1, %v23_v3  }
  0x8f   :  { %v30_v4 = vld [vmem:[#allocation2] sm:$0x1] }
  0x90   :  { %33 = vst [vmem:[%s78_s1] sm:$0x1] %v30_v4 }
  0x91   :  { %34 = vsyncpa [#allocation1], 1 }

// kernel: learner_model_forward.1
= control target key start
LH: loop header
LB: loop body
LE: loop exit
PB: predicated region body
PF: predicated region fallthrough
CT: control target
= control target key end

     0   :  { %vm54_vm0 = vcmask 1042432   ;;  %vm47_vm1 = vcmask 416768   ;;  %s1461_s0 = inlined_call_operand.vmem [shape: f32[16,51], index: 0, kind: input, shape index: {}]   ;;  %s1462_s1 = inlined_call_operand.vmem [shape: f32[16,32], index: 1, kind: input, shape index: {}]   ;;  %s1463_s2 = inlined_call_operand.vmem [shape: f32[16,16], index: 2, kind: input, shape index: {}]   ;;  %s1464_s3 = inlined_call_operand.vmem [shape: f32[2,16], index: 3, kind: input, shape index: {}]   ;;  %s1465_s4 = inlined_call_operand.vmem [shape: f32[51,32], index: 4, kind: input, shape index: {}]   ;;  %s1466_s5 = inlined_call_operand.vmem [shape: bf16[32,128], index: 5, kind: input, shape index: {}]   ;;  %s1467_s6 = inlined_call_operand.vmem [shape: bf16[32,128], index: 6, kind: input, shape index: {}]   ;;  %s1468_s7 = inlined_call_operand.vmem [shape: bf16[128,32], index: 7, kind: input, shape index: {}]   ;;  %s1469_s8 = inlined_call_operand.vmem [shape: f32[10,128], index: 8, kind: input, shape index: {}]   ;;  %s1470_s9 = inlined_call_operand.hbm [shape: f32[2,32], index: 9, kind: output, shape index: {}]  }
   0x1   :  { %v44_v0 = vld [vmem:[%s1465_s4 + $0x30] sm:$0x7]  ;;  %v43_v1 = vld [vmem:[%s1465_s4 + $0x28] sm:$0xff]  ;;  %v42_v2 = vld [vmem:[%s1465_s4 + $0x20] sm:$0xff] }
   0x2   :  { %1011 = vmatprep.subr.msk.mxu1 %vm54_vm0, %v44_v0  ;;  %v36_v3 = vld [vmem:[%s1461_s0] sm:$0xff]  ;;  %v41_v4 = vld [vmem:[%s1465_s4 + $0x18] sm:$0xff]  ;;  %v40_v5 = vld [vmem:[%s1465_s4 + $0x10] sm:$0xff] }
   0x3   :  { %1012 = vmatpush3.msk.msra.mxu1 %vm54_vm0, %v44_v0  ;;  %1025 = vmatprep.mubr.msk.f32.mxu1 %vm47_vm1, %v36_v3  ;;  %v39_v6 = vld [vmem:[%s1465_s4 + $0x8] sm:$0xff]  ;;  %v38_v7 = vld [vmem:[%s1465_s4] sm:$0xff] }
   0x4   :  { %1013 = vmatprep.subr.mxu1 %v43_v1 }
   0x5   :  { %1014 = vmatpush3.msra.mxu1 %v43_v1 }
   0x6   :  { %1015 = vmatprep.subr.mxu1 %v42_v2 }
   0x7   :  { %1016 = vmatpush3.msra.mxu1 %v42_v2 }
   0x8   :  { %1017 = vmatprep.subr.mxu1 %v41_v4 }
   0x9   :  { %1018 = vmatpush3.msra.mxu1 %v41_v4 }
   0xa   :  { %1019 = vmatprep.subr.mxu1 %v40_v5 }
   0xb   :  { %1020 = vmatpush3.msra.mxu1 %v40_v5 }
   0xc   :  { %1021 = vmatprep.subr.mxu1 %v39_v6 }
   0xd   :  { %14 = vsyncpa [#allocation3], 0  ;;  %1022 = vmatpush3.msra.mxu1 %v39_v6  ;;  %v37_v8 = vld [vmem:[%s1461_s0 + $0x8] sm:$0xff]  ;;  %v45_v10 = vld [vmem:[%s1462_s1] sm:$0xff]  ;;  %vm133_vm2 = vcmask 261120   ;;  %v1182_v28 = vmov 0.0   ;;  %v161_v36 = vlaneseq }
   0xe   :  { %1023 = vmatprep.subr.mxu1 %v38_v7  ;;  %v46_v11 = vld [vmem:[%s1462_s1 + $0x8] sm:$0xff]  ;;  %1042 = vmatprep.subr.bf16.mxu0 %v1182_v28  ;;  %v1291_v29 = vld [vmem:[%s1466_s5] sm:$0xff]   ;;  %vm1183_vm3 = vmmov 0   ;;  %s1184_s12 = smov 80   ;;  %s1185_s13 = smov 96   ;;  %vm244_vm4 = vcmask 130048  }
   0xf   :  { %1024 = vmatpush3.msra.mxu1 %v38_v7  ;;  %v1283_v27 = vld [vmem:[%s1466_s5 + $0x8] sm:$0xff]   ;;  %1044 = vmatprep.mubr.msk.bf16.mxu0 %vm1183_vm3, %v1182_v28  ;;  %v1300_v37 = vshrl.u32 %v161_v36, 7  ;;  %v1306_v39 = vld [vmem:[%s1469_s8] sm:$0xff]  ;;  %s1186_s14 = smov 112   ;;  %s1188_s19 = smov 48   ;;  %vm932_vm5 = vcmask 254976  }
  0x10   :  { %1026 = vmatmul.mubr.msk.f32.vlgmr.msra.gmra.mxu1 %vm47_vm1, %v37_v8  ;;  %1028 = vmatprep.subr.bf16.mxu1 %v1182_v28  ;;  %v238_v2 = vld [vmem:[%s1463_s2] sm:$0xff]  ;;  %v239_v6 = vld [vmem:[%s1463_s2 + $0x8] sm:$0xff]  ;;  %s1187_s2 = smov 64   ;;  %s1189_s20 = smov 32  }
  0x11   :  { %1029 = vmatpush3.bf16.msra.mxu1 %v1283_v27  ;;  %1032 = vmatprep.mubr.msk.bf16.mxu1 %vm1183_vm3, %v1182_v28  ;;  %v163_v38 = vsub.s32 1, %v1300_v37  ;;  %v169_v43 = vsub.s32 2, %v1300_v37  ;;  %v180_v52 = vsub.s32 0, %v1300_v37 }
  0x12   :  { %1030 = vmatprep.subr.bf16.mxu1 %v1182_v28 }
  0x13   :  { %v164_v42 = vrot.slane %v1306_v39, %v163_v38  ;;  %v170_v47 = vrot.slane %v1306_v39, %v169_v43  ;;  %v181_v54 = vrot.slane %v1306_v39, %v180_v52 }
  0x15   :  { %1031 = vmatpush3.bf16.msra.mxu1 %v1291_v29 }
  0x16   :  { %1036 = vmatprep.subr.bf16.mxu1 %v1182_v28 }
  0xd0   :  { %v1027_v9 = vpop.f32.mrf.mxu1 }
  0xd1   :  { %v130_v14 = vadd.f32 %v1027_v9, %v46_v11 }
  0xd2   :  { %v124_v12 = vpop.f32.mrf.mxu1 }
  0xd3   :  { %v125_v13 = vadd.f32 %v124_v12, %v45_v10  ;;  %v137_v16 = vsel %vm133_vm2, %v130_v14, 0.0 }
  0xd5   :  { %v134_v15 = vsel %vm133_vm2, %v125_v13, 0.0 }
  0xd6   :  { %135 = vadd.xlane.f32.xlu0 %v134_v15 }
  0xda   :  { %138 = vadd.xlane.f32.xlu0 %v137_v16 }
 0x15f   :  { %v136_v17 = vpop.xlane.xlu0 %135 }
 0x160   :  { %v141_v18 = vmul.f32 0.03125, %v136_v17 }
 0x162   :  { %v143_v19 = vsub.f32 %v125_v13, %v141_v18 }
 0x163   :  { %v139_v20 = vpop.xlane.xlu0 %138 }
 0x164   :  { %v142_v21 = vmul.f32 0.03125, %v139_v20  ;;  %v145_v22 = vmul.f32 %v143_v19, %v143_v19 }
 0x166   :  { %v144_v23 = vsub.f32 %v130_v14, %v142_v21  ;;  %v147_v24 = vsel %vm133_vm2, %v145_v22, 0.0 }
 0x167   :  { %148 = vadd.xlane.f32.xlu1 %v147_v24 }
 0x168   :  { %v146_v25 = vmul.f32 %v144_v23, %v144_v23 }
 0x16a   :  { %v150_v26 = vsel %vm133_vm2, %v146_v25, 0.0 }
 0x16b   :  { %151 = vadd.xlane.f32.xlu1 %v150_v26 }
 0x1f0   :  { %v149_v30 = vpop.xlane.xlu1 %148 }
 0x1f1   :  { %v153_v31 = vmul.f32 0.03125, %v149_v30 }
 0x1f3   :  { %v155_v32 = vadd.f32 1e-12, %v153_v31 }
 0x1f4   :  { %v152_v33 = vpop.xlane.xlu1 %151 }
 0x1f5   :  { %1128 = vrsqrt.f32 %v155_v32  ;;  %v154_v34 = vmul.f32 0.03125, %v152_v33 }
 0x1f7   :  { %v156_v35 = vadd.f32 1e-12, %v154_v34 }
 0x1f9   :  { %1130 = vrsqrt.f32 %v156_v35 }
 0x202   :  { %v1129_v40 = vpop.eup %1128 }
 0x203   :  { %v159_v41 = vmul.f32 %v1129_v40, %v143_v19 }
 0x205   :  { %v165_v46 = vmul.f32 %v164_v42, %v159_v41 }
 0x206   :  { %v1131_v44 = vpop.eup %1130 }
 0x207   :  { %v160_v45 = vmul.f32 %v1131_v44, %v144_v23  ;;  %v1313_v49 = vadd.f32 %v170_v47, %v165_v46 }
 0x209   :  { %v166_v48 = vmul.f32 %v164_v42, %v160_v45 }
 0x20b   :  { %v1315_v50 = vadd.f32 %v170_v47, %v166_v48 }
 0x20d   :  { %v177_v51 = vpack.c.bf16 %v1315_v50, %v1313_v49 }
 0x20f   :  { %1033 = vmatmul.mubr.msk.bf16.vlgmr.msra.gmra.mxu1 %vm133_vm2, %v177_v51 }
 0x210   :  { %1038 = vmatprep.mubr.msk.bf16.mxu1 %vm1183_vm3, %v1182_v28 }
 0x2cf   :  { %v231_v53 = vpop.f32.mrf.mxu1 }
 0x2d0   :  { %v232_v57 = vadd.f32 %v231_v53, %v181_v54 }
 0x2d1   :  { %v1034_v55 = vpop.f32.mrf.mxu1 }
 0x2d3   :  { %v234_v56 = vpop.f32.mrf.mxu1 }
 0x2d4   :  { %v235_v58 = vadd.f32 %v234_v56, %v181_v54 }
 0x2d5   :  { %v1035_v59 = vpop.f32.mrf.mxu1 }
 0x2d6   :  { %v1326_v60 = vpack.c.bf16 %v235_v58, %v232_v57 }
 0x2d8   :  { %365 = vrot.lane.b32.xlu1 %v1326_v60, %s1184_s12  ;;  %242 = vrot.lane.b32.xlu0 %v1326_v60, %s1185_s13 }
 0x2dc   :  { %363 = vrot.lane.b32.xlu1 %v1326_v60, %s1186_s14 }
 0x34a   :  { %v243_v61 = vpop.permute.xlu0 %242  ;;  %v366_v63 = vpop.permute.xlu1 %365 }
 0x34b   :  { %v249_v62 = vsel %vm244_vm4, %v243_v61, 0  ;;  %v371_v0 = vsel %vm244_vm4, %v366_v63, 0 }
 0x34c   :  { %1037 = vmatpush3.bf16.xpose.msra.mxu1 %v249_v62 }
 0x34d   :  { %1048 = vmatprep.subr.bf16.mxu1 %v1182_v28 }
 0x34e   :  { %v364_v1 = vpop.permute.xlu1 %363 }
 0x353   :  { %1039 = vmatmul.mubr.msk.bf16.vlgmr.msra.gmra.mxu1 %vm244_vm4, %v1326_v60 }
 0x354   :  { %1049 = vmatpush3.bf16.xpose.msra.mxu1 %v371_v0  ;;  %1050 = vmatprep.mubr.msk.bf16.mxu1 %vm1183_vm3, %v1182_v28 }
 0x355   :  { %1060 = vmatprep.subr.bf16.mxu1 %v1182_v28 }
 0x35b   :  { %1051 = vmatmul.mubr.msk.bf16.vlgmr.msra.gmra.mxu1 %vm244_vm4, %v364_v1 }
 0x35c   :  { %1062 = vmatprep.mubr.msk.bf16.mxu1 %vm1183_vm3, %v1182_v28 }
 0x413   :  { %v285_v3 = vpop.f32.mrf.mxu1 }
 0x414   :  { %v286_v4 = vadd.f32 %v285_v3, %v238_v2 }
 0x415   :  { %v1040_v5 = vpop.f32.mrf.mxu1 }
 0x416   :  { %v292_v7 = vsel %vm244_vm4, %v286_v4, -inf }
 0x417   :  { %293 = vmax.xlane.f32.xlu1 %v292_v7  ;;  %v288_v8 = vpop.f32.mrf.mxu1 }
 0x418   :  { %v289_v9 = vadd.f32 %v288_v8, %v239_v6 }
 0x419   :  { %v1041_v10 = vpop.f32.mrf.mxu1 }
 0x41a   :  { %v295_v11 = vsel %vm244_vm4, %v289_v9, -inf }
 0x41b   :  { %296 = vmax.xlane.f32.xlu0 %v295_v11  ;;  %v407_v12 = vpop.f32.mrf.mxu1 }
 0x41c   :  { %v408_v13 = vadd.f32 %v407_v12, %v238_v2 }
 0x41d   :  { %v1052_v14 = vpop.f32.mrf.mxu1 }
 0x41e   :  { %v414_v15 = vsel %vm244_vm4, %v408_v13, -inf }
 0x41f   :  { %415 = vmax.xlane.f32.xlu0 %v414_v15  ;;  %v410_v16 = vpop.f32.mrf.mxu1 }
 0x420   :  { %v411_v17 = vadd.f32 %v410_v16, %v239_v6 }
 0x421   :  { %v1053_v18 = vpop.f32.mrf.mxu1 }
 0x422   :  { %v417_v19 = vsel %vm244_vm4, %v411_v17, -inf }
 0x423   :  { %418 = vmax.xlane.f32.xlu0 %v417_v19 }
 0x4a0   :  { %v294_v20 = vpop.xlane.xlu1 %293 }
 0x4a1   :  { %v298_v21 = vsub.f32 %v286_v4, %v294_v20 }
 0x4a3   :  { %v300_v22 = vmul.f32 1.442695, %v298_v21 }
 0x4a4   :  { %v297_v23 = vpop.xlane.xlu0 %296 }
 0x4a5   :  { %1132 = vpow2.f32 %v300_v22  ;;  %v299_v24 = vsub.f32 %v289_v9, %v297_v23 }
 0x4a7   :  { %v302_v25 = vmul.f32 1.442695, %v299_v24 }
 0x4a8   :  { %v416_v26 = vpop.xlane.xlu0 %415 }
 0x4a9   :  { %1134 = vpow2.f32 %v302_v25  ;;  %v420_v30 = vsub.f32 %v408_v13, %v416_v26  ;;  %v581_v13 = vsub.s32 3, %v1300_v37 }
 0x4ab   :  { %v422_v31 = vmul.f32 1.442695, %v420_v30  ;;  %v582_v16 = vrot.slane %v1306_v39, %v581_v13 }
 0x4ac   :  { %v419_v32 = vpop.xlane.xlu0 %418 }
 0x4ad   :  { %1136 = vpow2.f32 %v422_v31  ;;  %v421_v33 = vsub.f32 %v411_v17, %v419_v32 }
 0x4af   :  { %v424_v34 = vmul.f32 1.442695, %v421_v33 }
 0x4b1   :  { %1138 = vpow2.f32 %v424_v34 }
 0x4b2   :  { %v1133_v35 = vpop.eup %1132 }
 0x4b3   :  { %v304_v36 = vsel %vm244_vm4, %v1133_v35, 0.0 }
 0x4b4   :  { %305 = vadd.xlane.f32.xlu1 %v304_v36 }
 0x4b6   :  { %v1135_v40 = vpop.eup %1134 }
 0x4b7   :  { %v307_v41 = vsel %vm244_vm4, %v1135_v40, 0.0 }
 0x4b8   :  { %308 = vadd.xlane.f32.xlu0 %v307_v41 }
 0x4ba   :  { %v1137_v42 = vpop.eup %1136 }
 0x4bb   :  { %v426_v43 = vsel %vm244_vm4, %v1137_v42, 0.0 }
 0x4bc   :  { %427 = vadd.xlane.f32.xlu1 %v426_v43 }
 0x4be   :  { %v1139_v44 = vpop.eup %1138 }
 0x4bf   :  { %v429_v45 = vsel %vm244_vm4, %v1139_v44, 0.0 }
 0x4c0   :  { %430 = vadd.xlane.f32.xlu0 %v429_v45 }
 0x4cd   :  { %315 = vrot.lane.b32.xlu1 %v1326_v60, %s1187_s2 }
 0x4d1   :  { %485 = vrot.lane.b32.xlu1 %v1283_v27, %s1189_s20 }
 0x4d5   :  { %532 = vrot.lane.b32.xlu1 %v1291_v29, %s1189_s20 }
 0x4d6   :  { %437 = vrot.lane.b32.xlu0 %v1326_v60, %s1188_s19 }
 0x53d   :  { %v306_v46 = vpop.xlane.xlu1 %305 }
 0x53e   :  { %1140 = vrcp.f32 %v306_v46 }
 0x541   :  { %v309_v47 = vpop.xlane.xlu0 %308 }
 0x542   :  { %1142 = vrcp.f32 %v309_v47 }
 0x545   :  { %v428_v48 = vpop.xlane.xlu1 %427 }
 0x546   :  { %1144 = vrcp.f32 %v428_v48 }
 0x549   :  { %v316_v51 = vpop.permute.xlu1 %315  ;;  %v431_v53 = vpop.xlane.xlu0 %430 }
 0x54a   :  { %1146 = vrcp.f32 %v431_v53  ;;  %1043 = vmatpush3.bf16.msra.mxu0 %v316_v51 }
 0x54b   :  { %1054 = vmatprep.subr.bf16.mxu0 %v1182_v28  ;;  %v1141_v54 = vpop.eup %1140 }
 0x54c   :  { %v312_v57 = vmul.f32 %v1141_v54, %v1133_v35  ;;  %v615_v54 = vsub.s32 4, %v1300_v37 }
 0x54d   :  { %v486_v56 = vpop.permute.xlu1 %485  ;;  %v438_v29 = vpop.permute.xlu0 %437 }
 0x54e   :  { %1061 = vmatpush3.bf16.msra.mxu1 %v486_v56 }
 0x54f   :  { %v1143_v55 = vpop.eup %1142  ;;  %1072 = vmatprep.subr.bf16.mxu1 %v1182_v28 }
 0x550   :  { %v313_v58 = vmul.f32 %v1143_v55, %v1135_v40 }
 0x551   :  { %v533_v0 = vpop.permute.xlu1 %532 }
 0x552   :  { %v314_v27 = vpack.c.bf16 %v313_v58, %v312_v57  ;;  %v616_v57 = vrot.slane %v1306_v39, %v615_v54  ;;  %v621_v58 = vsub.s32 5, %v1300_v37 }
 0x553   :  { %v1145_v59 = vpop.eup %1144 }
 0x554   :  { %1045 = vmatmul.mubr.msk.bf16.vlgmr.msra.gmra.mxu0 %vm244_vm4, %v314_v27  ;;  %v434_v61 = vmul.f32 %v1145_v59, %v1137_v42 }
 0x555   :  { %1055 = vmatpush3.bf16.msra.mxu0 %v438_v29  ;;  %1056 = vmatprep.mubr.msk.bf16.mxu0 %vm1183_vm3, %v1182_v28 }
 0x556   :  { %1066 = vmatprep.subr.bf16.mxu0 %v1182_v28 }
 0x557   :  { %v1147_v60 = vpop.eup %1146 }
 0x558   :  { %v435_v62 = vmul.f32 %v1147_v60, %v1139_v44  ;;  %v1119_v44 = vld [vmem:[%s1467_s6] sm:$0xff]   ;;  %v622_v60 = vrot.slane %v1306_v39, %v621_v58 }
 0x55a   :  { %v436_v63 = vpack.c.bf16 %v435_v62, %v434_v61 }
 0x55c   :  { %1057 = vmatmul.mubr.msk.bf16.vlgmr.msra.gmra.mxu0 %vm244_vm4, %v436_v63 }
 0x55d   :  { %1068 = vmatprep.mubr.msk.bf16.mxu0 %vm1183_vm3, %v1182_v28  ;;  %1067 = vmatpush3.bf16.msra.mxu0 %v533_v0 }
 0x55e   :  { %1080 = vmatprep.subr.bf16.mxu0 %v1182_v28 }
 0x614   :  { %v355_v1 = vpop.f32.mrf.mxu0 }
 0x616   :  { %v1046_v2 = vpop.f32.mrf.mxu0 }
 0x617   :  { %v1121_v2 = vld [vmem:[%s1468_s7 + $0x30] sm:$0xff]  }
 0x618   :  { %v358_v3 = vpop.f32.mrf.mxu0 }
 0x619   :  { %v362_v4 = vpack.c.bf16 %v358_v3, %v355_v1  ;;  %v1120_v1 = vld [vmem:[%s1468_s7 + $0x38] sm:$0xff]   ;;  %v1122_v3 = vld [vmem:[%s1468_s7 + $0x28] sm:$0xff]  }
 0x61a   :  { %v1047_v5 = vpop.f32.mrf.mxu0 }
 0x61b   :  { %1069 = vmatmul.mubr.msk.bf16.vlgmr.msra.gmra.mxu0 %vm244_vm4, %v362_v4  ;;  %v1123_v4 = vld [vmem:[%s1468_s7 + $0x20] sm:$0xff]   ;;  %v1124_v5 = vld [vmem:[%s1468_s7 + $0x18] sm:$0xff]  }
 0x61c   :  { %v477_v6 = vpop.f32.mrf.mxu0  ;;  %1096 = vmatprep.mubr.msk.bf16.mxu0 %vm1183_vm3, %v1182_v28  ;;  %1081 = vmatpush3.bf16.msra.mxu0 %v1120_v1 }
 0x61d   :  { %1082 = vmatprep.subr.bf16.mxu0 %v1182_v28 }
 0x61e   :  { %v1058_v7 = vpop.f32.mrf.mxu0 }
 0x61f   :  { %v1126_v7 = vld [vmem:[%s1468_s7 + $0x8] sm:$0xff]  }
 0x620   :  { %v480_v8 = vpop.f32.mrf.mxu0  ;;  %1083 = vmatpush3.bf16.msra.mxu0 %v1121_v2 }
 0x621   :  { %v484_v9 = vpack.c.bf16 %v480_v8, %v477_v6  ;;  %1084 = vmatprep.subr.bf16.mxu0 %v1182_v28  ;;  %v1125_v6 = vld [vmem:[%s1468_s7 + $0x10] sm:$0xff]   ;;  %v1127_v8 = vld [vmem:[%s1468_s7] sm:$0xff]  }
 0x622   :  { %v1059_v10 = vpop.f32.mrf.mxu0 }
 0x623   :  { %1063 = vmatmul.mubr.msk.bf16.vlgmr.msra.gmra.mxu1 %vm244_vm4, %v484_v9  ;;  %v632_v9 = vsub.s32 6, %v1300_v37 }
 0x624   :  { %1076 = vmatprep.mubr.msk.bf16.mxu1 %vm1183_vm3, %v1182_v28  ;;  %1085 = vmatpush3.bf16.msra.mxu0 %v1122_v3 }
 0x625   :  { %1086 = vmatprep.subr.bf16.mxu0 %v1182_v28  ;;  %v633_v10 = vrot.slane %v1306_v39, %v632_v9 }
 0x628   :  { %1087 = vmatpush3.bf16.msra.mxu0 %v1123_v4 }
 0x629   :  { %1088 = vmatprep.subr.bf16.mxu0 %v1182_v28 }
 0x62c   :  { %1089 = vmatpush3.bf16.msra.mxu0 %v1124_v5  ;;  %v35_v5 = vld [vmem:[%s1469_s8 + $0x8] sm:$0x3]  ;;  %s1190_s8 = smov [#allocation2]  }
 0x62d   :  { %1090 = vmatprep.subr.bf16.mxu0 %v1182_v28  ;;  %s940_s18 = sshll.u32 %s1190_s8, 4  ;;  %s941_s18 = int_to_ptr.vmem [resolvable:$true] %s940_s18 }
 0x62e   :  { %s1160_s2 = scalar_lea.vmem %s941_s18, 32  ;;  %p1165_p1 = scmp.lt.s32.totalorder %s941_s18, %s941_s18 }
 0x62f   :  { %p1161_p0 = scmp.ne.s32.totalorder %s941_s18, %s1160_s2  ;;  %p1166_p2 = scmp.lt.s32.totalorder %s1160_s2, %s1160_s2 }
 0x630   :  { %1091 = vmatpush3.bf16.msra.mxu0 %v1125_v6  ;;  %v849_v6 = vrot.slane %v35_v5, %v180_v52 }
 0x631   :  { %1092 = vmatprep.subr.bf16.mxu0 %v1182_v28  ;;  %p1167_p3 = por %p1166_p2, %p1165_p1 }
 0x633   :  { %p1168_p4 = pnand %p1167_p3, %p1161_p0 }
 0x634   :  { %1093 = vmatpush3.bf16.msra.mxu0 %v1126_v7 }
 0x635   :  { %1094 = vmatprep.subr.bf16.mxu0 %v1182_v28 }
 0x638   :  { %1095 = vmatpush3.bf16.msra.mxu0 %v1127_v8 }
 0x639   :  { %1100 = vmatprep.subr.mxu0 %v1182_v28 }
 0x6db   :  { %v572_v11 = vpop.f32.mrf.mxu0 }
 0x6dd   :  { %v1070_v12 = vpop.f32.mrf.mxu0 }
 0x6df   :  { %v575_v14 = vpop.f32.mrf.mxu0 }
 0x6e1   :  { %v1071_v15 = vpop.f32.mrf.mxu0 }
 0x6e3   :  { %v525_v17 = vpop.f32.mrf.mxu1 }
 0x6e4   :  { %v573_v18 = vadd.f32 %v572_v11, %v525_v17 }
 0x6e5   :  { %v1064_v19 = vpop.f32.mrf.mxu1 }
 0x6e6   :  { %v583_v20 = vadd.f32 %v582_v16, %v573_v18 }
 0x6e7   :  { %v528_v21 = vpop.f32.mrf.mxu1 }
 0x6e8   :  { %v576_v22 = vadd.f32 %v575_v14, %v528_v21  ;;  %v585_v23 = vadd.f32 %v583_v20, %v1313_v49 }
 0x6e9   :  { %v1065_v24 = vpop.f32.mrf.mxu1 }
 0x6ea   :  { %v584_v25 = vadd.f32 %v582_v16, %v576_v22  ;;  %v587_v26 = vsel %vm133_vm2, %v585_v23, 0.0 }
 0x6eb   :  { %588 = vadd.xlane.f32.xlu1 %v587_v26 }
 0x6ec   :  { %v586_v30 = vadd.f32 %v584_v25, %v1315_v50  ;;  %v1118_v50 = vld [vmem:[%s1467_s6 + $0x8] sm:$0xff]  }
 0x6ed   :  { %1073 = vmatpush3.bf16.msra.mxu1 %v1118_v50 }
 0x6ee   :  { %v590_v31 = vsel %vm133_vm2, %v586_v30, 0.0  ;;  %1074 = vmatprep.subr.bf16.mxu1 %v1182_v28 }
 0x6ef   :  { %591 = vadd.xlane.f32.xlu0 %v590_v31 }
 0x6f1   :  { %1075 = vmatpush3.bf16.msra.mxu1 %v1119_v44 }
 0x774   :  { %v589_v32 = vpop.xlane.xlu1 %588 }
 0x775   :  { %v593_v33 = vmul.f32 0.03125, %v589_v32 }
 0x777   :  { %v595_v34 = vsub.f32 %v585_v23, %v593_v33 }
 0x778   :  { %v592_v35 = vpop.xlane.xlu0 %591 }
 0x779   :  { %v594_v36 = vmul.f32 0.03125, %v592_v35  ;;  %v597_v40 = vmul.f32 %v595_v34, %v595_v34 }
 0x77b   :  { %v596_v41 = vsub.f32 %v586_v30, %v594_v36  ;;  %v599_v42 = vsel %vm133_vm2, %v597_v40, 0.0 }
 0x77c   :  { %600 = vadd.xlane.f32.xlu0 %v599_v42  ;;  %v727_v42 = vsub.s32 7, %v1300_v37 }
 0x77d   :  { %v598_v49 = vmul.f32 %v596_v41, %v596_v41 }
 0x77f   :  { %v602_v43 = vsel %vm133_vm2, %v598_v49, 0.0  ;;  %v728_v49 = vrot.slane %v1306_v39, %v727_v42 }
 0x780   :  { %603 = vadd.xlane.f32.xlu0 %v602_v43 }
 0x805   :  { %v601_v45 = vpop.xlane.xlu0 %600 }
 0x806   :  { %v605_v46 = vmul.f32 0.03125, %v601_v45 }
 0x808   :  { %v607_v47 = vadd.f32 1e-12, %v605_v46 }
 0x809   :  { %v604_v48 = vpop.xlane.xlu0 %603 }
 0x80a   :  { %1148 = vrsqrt.f32 %v607_v47  ;;  %v606_v51 = vmul.f32 0.03125, %v604_v48 }
 0x80c   :  { %v608_v53 = vadd.f32 1e-12, %v606_v51 }
 0x80e   :  { %1150 = vrsqrt.f32 %v608_v53 }
 0x817   :  { %v1149_v55 = vpop.eup %1148 }
 0x818   :  { %v611_v56 = vmul.f32 %v1149_v55, %v595_v34 }
 0x81a   :  { %v617_v59 = vmul.f32 %v616_v57, %v611_v56 }
 0x81b   :  { %v1151_v27 = vpop.eup %1150 }
 0x81c   :  { %v612_v29 = vmul.f32 %v1151_v27, %v596_v41  ;;  %v1395_v62 = vadd.f32 %v622_v60, %v617_v59 }
 0x81e   :  { %v618_v61 = vmul.f32 %v616_v57, %v612_v29 }
 0x820   :  { %v1397_v63 = vadd.f32 %v622_v60, %v618_v61 }
 0x822   :  { %v625_v0 = vpack.c.bf16 %v1397_v63, %v1395_v62 }
 0x824   :  { %1077 = vmatmul.mubr.msk.bf16.vlgmr.msra.gmra.mxu1 %vm133_vm2, %v625_v0 }
 0x8e4   :  { %v683_v11 = vpop.f32.mrf.mxu1 }
 0x8e5   :  { %v684_v12 = vadd.f32 %v683_v11, %v633_v10 }
 0x8e6   :  { %v1078_v13 = vpop.f32.mrf.mxu1 }
 0x8e7   :  { %v692_v14 = vmul.f32 0.044715, %v684_v12  ;;  %v690_v33 = vmul.f32 0.5, %v684_v12 }
 0x8e8   :  { %v686_v15 = vpop.f32.mrf.mxu1 }
 0x8e9   :  { %v694_v16 = vmul.f32 %v692_v14, %v684_v12  ;;  %v687_v17 = vadd.f32 %v686_v15, %v633_v10  ;;  %v855_v10 = vrot.slane %v35_v5, %v163_v38  ;;  %v858_v15 = vld [vmem:[%s1464_s3] sm:$0x3] }
 0x8ea   :  { %v1079_v18 = vpop.f32.mrf.mxu1 }
 0x8eb   :  { %v696_v19 = vmul.f32 %v694_v16, %v684_v12  ;;  %v693_v20 = vmul.f32 0.044715, %v687_v17  ;;  %v691_v34 = vmul.f32 0.5, %v687_v17 }
 0x8ed   :  { %v698_v21 = vadd.f32 %v696_v19, %v684_v12  ;;  %v695_v22 = vmul.f32 %v693_v20, %v687_v17 }
 0x8ef   :  { %v700_v23 = vmul.f32 0.7978846, %v698_v21  ;;  %v697_v24 = vmul.f32 %v695_v22, %v687_v17 }
 0x8f1   :  { %1152 = vtanh.f32 %v700_v23  ;;  %v699_v25 = vadd.f32 %v697_v24, %v687_v17 }
 0x8f3   :  { %v701_v26 = vmul.f32 0.7978846, %v699_v25 }
 0x8f5   :  { %1154 = vtanh.f32 %v701_v26 }
 0x8fe   :  { %v1153_v30 = vpop.eup %1152 }
 0x8ff   :  { %v704_v31 = vadd.f32 1.0, %v1153_v30 }
 0x901   :  { %v706_v36 = vmul.f32 %v704_v31, %v690_v33 }
 0x902   :  { %v1155_v32 = vpop.eup %1154 }
 0x903   :  { %v705_v35 = vadd.f32 1.0, %v1155_v32 }
 0x905   :  { %v707_v40 = vmul.f32 %v705_v35, %v691_v34 }
 0x907   :  { %v708_v41 = vpack.c.bf16 %v707_v40, %v706_v36 }
 0x909   :  { %1097 = vmatmul.mubr.bf16.vlgmr.msra.gmra.mxu0 %v708_v41 }
 0x90a   :  { %1104 = vmatprep.mubr.msk.f32.mxu0 %vm1183_vm3, %v1182_v28 }
 0x9c9   :  { %v811_v43 = vpop.f32.mrf.mxu0 }
 0x9ca   :  { %v812_v50 = vadd.f32 %v811_v43, %v728_v49 }
 0x9cb   :  { %v1098_v44 = vpop.f32.mrf.mxu0 }
 0x9cc   :  { %v818_v45 = vadd.f32 %v812_v50, %v1395_v62 }
 0x9cd   :  { %v814_v46 = vpop.f32.mrf.mxu0 }
 0x9ce   :  { %v815_v47 = vadd.f32 %v814_v46, %v728_v49  ;;  %v820_v48 = vsel %vm133_vm2, %v818_v45, 0.0 }
 0x9cf   :  { %821 = vadd.xlane.f32.xlu0 %v820_v48  ;;  %v1099_v51 = vpop.f32.mrf.mxu0 }
 0x9d0   :  { %v819_v53 = vadd.f32 %v815_v47, %v1397_v63 }
 0x9d2   :  { %v823_v54 = vsel %vm133_vm2, %v819_v53, 0.0 }
 0x9d3   :  { %824 = vadd.xlane.f32.xlu1 %v823_v54 }
 0xa58   :  { %v822_v55 = vpop.xlane.xlu0 %821 }
 0xa59   :  { %v826_v56 = vmul.f32 0.03125, %v822_v55 }
 0xa5b   :  { %v828_v57 = vsub.f32 %v818_v45, %v826_v56 }
 0xa5c   :  { %v825_v39 = vpop.xlane.xlu1 %824 }
 0xa5d   :  { %v827_v58 = vmul.f32 0.03125, %v825_v39  ;;  %v830_v27 = vmul.f32 %v828_v57, %v828_v57 }
 0xa5f   :  { %v829_v29 = vsub.f32 %v819_v53, %v827_v58  ;;  %v832_v59 = vsel %vm133_vm2, %v830_v27, 0.0 }
 0xa60   :  { %833 = vadd.xlane.f32.xlu0 %v832_v59 }
 0xa61   :  { %v831_v60 = vmul.f32 %v829_v29, %v829_v29 }
 0xa63   :  { %v835_v61 = vsel %vm133_vm2, %v831_v60, 0.0 }
 0xa64   :  { %836 = vadd.xlane.f32.xlu1 %v835_v61 }
 0xae9   :  { %v834_v62 = vpop.xlane.xlu0 %833 }
 0xaea   :  { %v838_v0 = vmul.f32 0.03125, %v834_v62 }
 0xaec   :  { %v840_v63 = vadd.f32 1e-12, %v838_v0 }
 0xaed   :  { %v837_v1 = vpop.xlane.xlu1 %836 }
 0xaee   :  { %1156 = vrsqrt.f32 %v840_v63  ;;  %v839_v2 = vmul.f32 0.03125, %v837_v1 }
 0xaf0   :  { %v841_v3 = vadd.f32 1e-12, %v839_v2 }
 0xaf2   :  { %1158 = vrsqrt.f32 %v841_v3 }
 0xafb   :  { %v1157_v4 = vpop.eup %1156 }
 0xafc   :  { %v844_v7 = vmul.f32 %v1157_v4, %v828_v57 }
 0xafe   :  { %v850_v12 = vmul.f32 %v849_v6, %v844_v7 }
 0xaff   :  { %v1159_v8 = vpop.eup %1158 }
 0xb00   :  { %v845_v9 = vmul.f32 %v1159_v8, %v829_v29  ;;  %v856_v14 = vadd.f32 %v855_v10, %v850_v12 }
 0xb02   :  { %v851_v11 = vmul.f32 %v849_v6, %v845_v9 }
 0xb04   :  { %v857_v13 = vadd.f32 %v855_v10, %v851_v11 }
 0xb06   :  { %1101 = vmatpush3.msra.mxu0 %v857_v13 }
 0xb07   :  { %1102 = vmatprep.subr.mxu0 %v1182_v28 }
 0xb08   :  { %1103 = vmatpush3.msra.mxu0 %v856_v14 }
 0xb09   :  { %1105 = vmatmul.mubr.msk.f32.vlgmr.msra.gmra.mxu0 %vm244_vm4, %v858_v15 }
 0xbc9   :  { %v928_v37 = vpop.f32.mrf.mxu0 }
 0xbca   :  { %933 = vst.msk [vmem:[#allocation2] sm:$0x3] %vm932_vm5, %v928_v37 }
 0xbcb   :  { %v1106_v38 = vpop.f32.mrf.mxu0 }
 0xbcc   :  { %1171 = shalt.err (!%p1168_p4)
}
 0xbcd   :  { %943 = dma.vmem_to_hbm [thread:$0]  %s941_s18, 32, %s1470_s9, [#allocation3]  }
 0xbce   :  { %1180 = dma.done.wait [#allocation3], 32  }
 0xbcf   :  { %1181 = vsyncadd [#allocation3], 4294967264 }
 0xbd0   :  { %947 = vsyncpa [#allocation3], 1 }

</bundles_post_ra>
